<compile_context>
chip_gen: v5e
topology: v5e:2x2
jax: 0.10.0
libtpu: 0.0.40
codegen_flags: <defaults>
</compile_context>

<pallas_src>
import jax
import jax.numpy as jnp
from jax.experimental import pallas as pl
from jax.experimental.pallas import tpu as pltpu

EPS = 1e-5
IN_DIM = 196
HID_DIM = 196
CLS_DIM = 10
TGT_DIM = 2
OUT_W = 2 * CLS_DIM + TGT_DIM      # packed output columns: [d1 | d2 | target]
MAX_TILE_B = 2048
SUBLANE = 16                       # bf16 sublane packing granularity


def _cdiv(a, b):
    return (a + b - 1) // b


def _round_up(x, m):
    return ((x + m - 1) // m) * m


def _choose_tile_b(B):
    """Balanced batch tiles: big enough to amortize per-grid-step overhead,
    >= 2 steps for large B so the 'parallel' axis shards across v7x's 2 TCs."""
    nb = _cdiv(B, MAX_TILE_B)
    if nb == 1 and B > 8 * SUBLANE:
        nb = 2
    tile = _round_up(_cdiv(B, nb), SUBLANE)
    return tile, nb


def _softmax_rows(z):
    # f32 throughout; exact division (outputs are the model's final probs).
    z = z - jnp.max(z, axis=1, keepdims=True)
    e = jnp.exp(z)
    return e / jnp.sum(e, axis=1, keepdims=True)


def fnn_ws_aux_kernel(
    x_ref,                       # (2, TILE_B, 196) bf16  — branch-stacked inputs
    w1_ref, b1_ref,              # (196, 196) bf16, (1, 196) f32   [BN1 folded]
    w2_ref, b2_ref,              # (196, 10)  bf16, (1, 10)  f32   [BN2 folded]
    wp1_ref, wp2_ref, bp_ref,    # (10, 2) bf16, (10, 2) bf16, (1, 2) f32
    out_ref,                     # (TILE_B, 22) f32 — [d1 | d2 | target]
):
    tb = x_ref.shape[1]
    # Free reshape: merge the branch axis into the sublane (batch) axis so both
    # siamese branches go through W1/W2 in a single MXU pass per tile.
    x = x_ref[...].reshape(2 * tb, IN_DIM)

    # Linear(196,196) + folded BatchNorm1d(196), then ReLU.
    h = jnp.dot(x, w1_ref[...], preferred_element_type=jnp.float32) + b1_ref[...]
    h = jnp.maximum(h, 0.0)

    # Linear(196,10) + folded BatchNorm1d(10), then Softmax(dim=1).
    z = jnp.dot(h.astype(jnp.bfloat16), w2_ref[...],
                preferred_element_type=jnp.float32) + b2_ref[...]
    d = _softmax_rows(z)                           # (2*tb, 10) f32

    d1 = d[:tb]                                    # sublane-aligned (tb % 16 == 0)
    d2 = d[tb:]

    # predictor: Linear(20,2) on cat([d1, d2], dim=1) == d1 @ Wp[:10] + d2 @ Wp[10:]
    p = (jnp.dot(d1.astype(jnp.bfloat16), wp1_ref[...],
                 preferred_element_type=jnp.float32)
         + jnp.dot(d2.astype(jnp.bfloat16), wp2_ref[...],
                   preferred_element_type=jnp.float32)
         + bp_ref[...])
    t = _softmax_rows(p)                           # (tb, 2) f32

    # Single packed output slab -> one writeback stream per grid step.
    out_ref[...] = jnp.concatenate([d1, d2, t], axis=1)


def init_params(key):
    """Raw parameters, mirroring the PyTorch module (Linear weights stored (in, out))."""
    ks = jax.random.split(key, 8)
    p = {}
    p["w1"] = jax.random.normal(ks[0], (IN_DIM, HID_DIM), jnp.float32) * 0.05
    p["b1"] = jax.random.normal(ks[1], (1, HID_DIM), jnp.float32) * 0.05
    p["g1"] = 1.0 + 0.1 * jax.random.normal(ks[2], (1, HID_DIM), jnp.float32)
    p["be1"] = 0.1 * jax.random.normal(ks[3], (1, HID_DIM), jnp.float32)
    p["rm1"] = 0.1 * jax.random.normal(ks[4], (1, HID_DIM), jnp.float32)
    p["rv1"] = 1.0 + 0.1 * jnp.abs(jax.random.normal(ks[5], (1, HID_DIM), jnp.float32))
    p["w2"] = jax.random.normal(ks[6], (HID_DIM, CLS_DIM), jnp.float32) * 0.05
    p["b2"] = jax.random.normal(ks[7], (1, CLS_DIM), jnp.float32) * 0.05
    ks2 = jax.random.split(ks[0], 8)
    p["g2"] = 1.0 + 0.1 * jax.random.normal(ks2[0], (1, CLS_DIM), jnp.float32)
    p["be2"] = 0.1 * jax.random.normal(ks2[1], (1, CLS_DIM), jnp.float32)
    p["rm2"] = 0.1 * jax.random.normal(ks2[2], (1, CLS_DIM), jnp.float32)
    p["rv2"] = 1.0 + 0.1 * jnp.abs(jax.random.normal(ks2[3], (1, CLS_DIM), jnp.float32))
    p["wp1"] = jax.random.normal(ks2[4], (CLS_DIM, TGT_DIM), jnp.float32) * 0.2
    p["wp2"] = jax.random.normal(ks2[5], (CLS_DIM, TGT_DIM), jnp.float32) * 0.2
    p["bp"] = jax.random.normal(ks2[6], (1, TGT_DIM), jnp.float32) * 0.1
    return p


def fold_params(p):
    """One-time prep: fold eval-mode BatchNorm into the Linears; cast MXU weights to bf16."""
    s1 = p["g1"] * jax.lax.rsqrt(p["rv1"] + EPS)                   # (1, 196)
    w1 = (p["w1"] * s1).astype(jnp.bfloat16)
    b1 = (p["b1"] - p["rm1"]) * s1 + p["be1"]

    s2 = p["g2"] * jax.lax.rsqrt(p["rv2"] + EPS)                   # (1, 10)
    w2 = (p["w2"] * s2).astype(jnp.bfloat16)
    b2 = (p["b2"] - p["rm2"]) * s2 + p["be2"]

    return {
        "w1": w1, "b1": b1.astype(jnp.float32),
        "w2": w2, "b2": b2.astype(jnp.float32),
        "wp1": p["wp1"].astype(jnp.bfloat16),
        "wp2": p["wp2"].astype(jnp.bfloat16),
        "bp": p["bp"].astype(jnp.float32),
    }


@jax.jit
def fnn_ws_aux(im1, im2, fp):
    B = im1.shape[0]
    x1 = im1.reshape(B, IN_DIM)        # == torch .view(-1, 196)  (metadata only)
    x2 = im2.reshape(B, IN_DIM)

    TILE_B, nb = _choose_tile_b(B)
    B_pad = TILE_B * nb

    # Single fused wrapper pass: stack both branches, pad the batch, cast bf16.
    x = jnp.stack([x1, x2], axis=0)                 # (2, B, 196)
    if B_pad != B:
        x = jnp.pad(x, ((0, 0), (0, B_pad - B), (0, 0)))
    x = x.astype(jnp.bfloat16)                      # (2, B_pad, 196)

    flops = (2 * (2 * B_pad) * IN_DIM * HID_DIM
             + 2 * (2 * B_pad) * HID_DIM * CLS_DIM
             + 2 * (2 * B_pad) * CLS_DIM * TGT_DIM)
    transcendentals = (2 * B_pad) * CLS_DIM + B_pad * TGT_DIM
    bytes_accessed = (2 * B_pad * IN_DIM * 2
                      + (IN_DIM * HID_DIM + HID_DIM * CLS_DIM + 2 * CLS_DIM * TGT_DIM) * 2
                      + (HID_DIM + CLS_DIM + TGT_DIM) * 4
                      + B_pad * OUT_W * 4)

    packed = pl.pallas_call(
        fnn_ws_aux_kernel,
        out_shape=jax.ShapeDtypeStruct((B_pad, OUT_W), jnp.float32),
        grid=(nb,),
        in_specs=[
            pl.BlockSpec((2, TILE_B, IN_DIM), lambda i: (0, i, 0)),
            # Weights/biases: whole array, constant index -> VMEM-resident.
            pl.BlockSpec((IN_DIM, HID_DIM), lambda i: (0, 0)),
            pl.BlockSpec((1, HID_DIM), lambda i: (0, 0)),
            pl.BlockSpec((HID_DIM, CLS_DIM), lambda i: (0, 0)),
            pl.BlockSpec((1, CLS_DIM), lambda i: (0, 0)),
            pl.BlockSpec((CLS_DIM, TGT_DIM), lambda i: (0, 0)),
            pl.BlockSpec((CLS_DIM, TGT_DIM), lambda i: (0, 0)),
            pl.BlockSpec((1, TGT_DIM), lambda i: (0, 0)),
        ],
        out_specs=pl.BlockSpec((TILE_B, OUT_W), lambda i: (i, 0)),
        compiler_params=pltpu.CompilerParams(
            dimension_semantics=("parallel",),       # batch tiles independent
            vmem_limit_bytes=32 * 1024 * 1024,       # headroom for v7x's 64 MiB VMEM
        ),
        cost_estimate=pl.CostEstimate(
            flops=flops,
            transcendentals=transcendentals,
            bytes_accessed=bytes_accessed,
        ),
    )(x, fp["w1"], fp["b1"], fp["w2"], fp["b2"], fp["wp1"], fp["wp2"], fp["bp"])

    d1 = packed[:B, :CLS_DIM]
    d2 = packed[:B, CLS_DIM:2 * CLS_DIM]
    target = packed[:B, 2 * CLS_DIM:]
    return d1, d2, target


def _ref_forward(im1, im2, p):
    """Pure-JAX eval-mode reference (unfolded BN, f32 everywhere)."""
    def backbone(x):
        h = x @ p["w1"] + p["b1"]
        h = (h - p["rm1"]) * jax.lax.rsqrt(p["rv1"] + EPS) * p["g1"] + p["be1"]
        h = jnp.maximum(h, 0.0)
        z = h @ p["w2"] + p["b2"]
        z = (z - p["rm2"]) * jax.lax.rsqrt(p["rv2"] + EPS) * p["g2"] + p["be2"]
        return jax.nn.softmax(z, axis=1)

    B = im1.shape[0]
    d1 = backbone(im1.reshape(B, IN_DIM))
    d2 = backbone(im2.reshape(B, IN_DIM))
    wp = jnp.concatenate([p["wp1"], p["wp2"]], axis=0)
    t = jax.nn.softmax(jnp.concatenate([d1, d2], axis=1) @ wp + p["bp"], axis=1)
    return d1, d2, t


if __name__ == "__main__":
    key = jax.random.PRNGKey(0)
    k_im1, k_im2, k_params = jax.random.split(key, 3)

    B = 8
    im1 = jax.random.normal(k_im1, (B, 1, 14, 14), jnp.float32)
    im2 = jax.random.normal(k_im2, (B, 1, 14, 14), jnp.float32)
    params = init_params(k_params)
    fp = fold_params(params)

    d1, d2, target = fnn_ws_aux(im1, im2, fp)
    jax.block_until_ready((d1, d2, target))

    assert d1.shape == (B, CLS_DIM)
    assert d2.shape == (B, CLS_DIM)
    assert target.shape == (B, TGT_DIM)

    # softmax rows sum to 1 (exact division -> only f32 rounding error)
    assert bool(jnp.allclose(jnp.sum(d1, axis=1), 1.0, atol=1e-3))
    assert bool(jnp.allclose(jnp.sum(d2, axis=1), 1.0, atol=1e-3))
    assert bool(jnp.allclose(jnp.sum(target, axis=1), 1.0, atol=1e-3))

    # cross-check against unfolded f32 reference (bf16 MXU -> loose tolerance)
    r1, r2, rt = _ref_forward(im1, im2, params)
    assert bool(jnp.allclose(d1, r1, atol=2e-2))
    assert bool(jnp.allclose(d2, r2, atol=2e-2))
    assert bool(jnp.allclose(target, rt, atol=2e-2))

    print("KERNEL_OK")
</pallas_src>

<mosaic_0001>
module attributes {stable_mosaic.version = 11 : i64} {
  func.func @fnn_ws_aux_kernel(%arg0: i32, %arg1: memref<2x16x196xbf16, #tpu.memory_space<vmem>>, %arg2: memref<196x196xbf16, #tpu.memory_space<vmem>>, %arg3: memref<1x196xf32, #tpu.memory_space<vmem>>, %arg4: memref<196x10xbf16, #tpu.memory_space<vmem>>, %arg5: memref<1x10xf32, #tpu.memory_space<vmem>>, %arg6: memref<10x2xbf16, #tpu.memory_space<vmem>>, %arg7: memref<10x2xbf16, #tpu.memory_space<vmem>>, %arg8: memref<1x2xf32, #tpu.memory_space<vmem>>, %arg9: memref<16x22xf32, #tpu.memory_space<vmem>>) attributes {dimension_semantics = [#tpu.dimension_semantics<parallel>], iteration_bounds = array<i64: 1>, scalar_prefetch = 0 : i64, scratch_operands = 0 : i64, tpu.core_type = #tpu.core_type<tc>, window_params = [{transform_indices = @transform_0, window_bounds = array<i64: 2, 16, 196>}, {pipeline_mode = #tpu.pipeline_mode<synchronous>, transform_indices = @transform_1, window_bounds = array<i64: 196, 196>}, {pipeline_mode = #tpu.pipeline_mode<synchronous>, transform_indices = @transform_2, window_bounds = array<i64: 1, 196>}, {pipeline_mode = #tpu.pipeline_mode<synchronous>, transform_indices = @transform_3, window_bounds = array<i64: 196, 10>}, {pipeline_mode = #tpu.pipeline_mode<synchronous>, transform_indices = @transform_4, window_bounds = array<i64: 1, 10>}, {pipeline_mode = #tpu.pipeline_mode<synchronous>, transform_indices = @transform_5, window_bounds = array<i64: 10, 2>}, {pipeline_mode = #tpu.pipeline_mode<synchronous>, transform_indices = @transform_6, window_bounds = array<i64: 10, 2>}, {pipeline_mode = #tpu.pipeline_mode<synchronous>, transform_indices = @transform_7, window_bounds = array<i64: 1, 2>}, {transform_indices = @transform_8, window_bounds = array<i64: 16, 22>}]} {
    %c0 = arith.constant 0 : index
    %c0_0 = arith.constant 0 : index
    %c0_1 = arith.constant 0 : index
    %0 = vector.load %arg1[%c0, %c0_0, %c0_1] : memref<2x16x196xbf16, #tpu.memory_space<vmem>>, vector<2x16x196xbf16>
    %1 = vector.shape_cast %0 : vector<2x16x196xbf16> to vector<32x196xbf16>
    %c0_2 = arith.constant 0 : index
    %c0_3 = arith.constant 0 : index
    %2 = vector.load %arg2[%c0_2, %c0_3] : memref<196x196xbf16, #tpu.memory_space<vmem>>, vector<196x196xbf16>
    %cst = arith.constant dense<0.000000e+00> : vector<32x196xf32>
    %3 = tpu.matmul %1, %2, %cst {dimension_numbers = #tpu.dot_dimension_numbers<[1], [0], [0], [1], [0, 0, 1, 1], [], []>} : vector<32x196xbf16>, vector<196x196xbf16>, vector<32x196xf32> -> vector<32x196xf32>
    %c0_4 = arith.constant 0 : index
    %c0_5 = arith.constant 0 : index
    %4 = vector.load %arg3[%c0_4, %c0_5] : memref<1x196xf32, #tpu.memory_space<vmem>>, vector<1x196xf32>
    %5 = vector.broadcast %4 : vector<1x196xf32> to vector<32x196xf32>
    %6 = arith.addf %3, %5 : vector<32x196xf32>
    %cst_6 = arith.constant 0.000000e+00 : f32
    %7 = vector.broadcast %cst_6 : f32 to vector<32x196xf32>
    %8 = arith.maximumf %6, %7 : vector<32x196xf32>
    %9 = arith.truncf %8 : vector<32x196xf32> to vector<32x196xbf16>
    %c0_7 = arith.constant 0 : index
    %c0_8 = arith.constant 0 : index
    %10 = vector.load %arg4[%c0_7, %c0_8] : memref<196x10xbf16, #tpu.memory_space<vmem>>, vector<196x10xbf16>
    %cst_9 = arith.constant dense<0.000000e+00> : vector<32x10xf32>
    %11 = tpu.matmul %9, %10, %cst_9 {dimension_numbers = #tpu.dot_dimension_numbers<[1], [0], [0], [1], [0, 0, 1, 1], [], []>} : vector<32x196xbf16>, vector<196x10xbf16>, vector<32x10xf32> -> vector<32x10xf32>
    %c0_10 = arith.constant 0 : index
    %c0_11 = arith.constant 0 : index
    %12 = vector.load %arg5[%c0_10, %c0_11] : memref<1x10xf32, #tpu.memory_space<vmem>>, vector<1x10xf32>
    %13 = vector.broadcast %12 : vector<1x10xf32> to vector<32x10xf32>
    %14 = arith.addf %11, %13 : vector<32x10xf32>
    %cst_12 = arith.constant dense<0xFF800000> : vector<32xf32>
    %15 = vector.multi_reduction <maximumf>, %14, %cst_12 [1] : vector<32x10xf32> to vector<32xf32>
    %16 = vector.shape_cast %15 : vector<32xf32> to vector<32x1xf32>
    %17 = vector.broadcast %16 : vector<32x1xf32> to vector<32x10xf32>
    %18 = arith.subf %14, %17 : vector<32x10xf32>
    %19 = math.exp %18 : vector<32x10xf32>
    %cst_13 = arith.constant dense<0.000000e+00> : vector<32xf32>
    %20 = vector.multi_reduction <add>, %19, %cst_13 [1] : vector<32x10xf32> to vector<32xf32>
    %21 = vector.shape_cast %20 : vector<32xf32> to vector<32x1xf32>
    %22 = vector.broadcast %21 : vector<32x1xf32> to vector<32x10xf32>
    %23 = arith.divf %19, %22 : vector<32x10xf32>
    %24 = vector.extract_strided_slice %23 {offsets = [0, 0], sizes = [16, 10], strides = [1, 1]} : vector<32x10xf32> to vector<16x10xf32>
    %25 = vector.extract_strided_slice %23 {offsets = [16, 0], sizes = [16, 10], strides = [1, 1]} : vector<32x10xf32> to vector<16x10xf32>
    %26 = arith.truncf %24 : vector<16x10xf32> to vector<16x10xbf16>
    %c0_14 = arith.constant 0 : index
    %c0_15 = arith.constant 0 : index
    %27 = vector.load %arg6[%c0_14, %c0_15] : memref<10x2xbf16, #tpu.memory_space<vmem>>, vector<10x2xbf16>
    %cst_16 = arith.constant dense<0.000000e+00> : vector<16x2xf32>
    %28 = tpu.matmul %26, %27, %cst_16 {dimension_numbers = #tpu.dot_dimension_numbers<[1], [0], [0], [1], [0, 0, 1, 1], [], []>} : vector<16x10xbf16>, vector<10x2xbf16>, vector<16x2xf32> -> vector<16x2xf32>
    %29 = arith.truncf %25 : vector<16x10xf32> to vector<16x10xbf16>
    %c0_17 = arith.constant 0 : index
    %c0_18 = arith.constant 0 : index
    %30 = vector.load %arg7[%c0_17, %c0_18] : memref<10x2xbf16, #tpu.memory_space<vmem>>, vector<10x2xbf16>
    %cst_19 = arith.constant dense<0.000000e+00> : vector<16x2xf32>
    %31 = tpu.matmul %29, %30, %cst_19 {dimension_numbers = #tpu.dot_dimension_numbers<[1], [0], [0], [1], [0, 0, 1, 1], [], []>} : vector<16x10xbf16>, vector<10x2xbf16>, vector<16x2xf32> -> vector<16x2xf32>
    %32 = arith.addf %28, %31 : vector<16x2xf32>
    %c0_20 = arith.constant 0 : index
    %c0_21 = arith.constant 0 : index
    %33 = vector.load %arg8[%c0_20, %c0_21] : memref<1x2xf32, #tpu.memory_space<vmem>>, vector<1x2xf32>
    %34 = vector.broadcast %33 : vector<1x2xf32> to vector<16x2xf32>
    %35 = arith.addf %32, %34 : vector<16x2xf32>
    %cst_22 = arith.constant dense<0xFF800000> : vector<16xf32>
    %36 = vector.multi_reduction <maximumf>, %35, %cst_22 [1] : vector<16x2xf32> to vector<16xf32>
    %37 = vector.shape_cast %36 : vector<16xf32> to vector<16x1xf32>
    %38 = vector.broadcast %37 : vector<16x1xf32> to vector<16x2xf32>
    %39 = arith.subf %35, %38 : vector<16x2xf32>
    %40 = math.exp %39 : vector<16x2xf32>
    %cst_23 = arith.constant dense<0.000000e+00> : vector<16xf32>
    %41 = vector.multi_reduction <add>, %40, %cst_23 [1] : vector<16x2xf32> to vector<16xf32>
    %42 = vector.shape_cast %41 : vector<16xf32> to vector<16x1xf32>
    %43 = vector.broadcast %42 : vector<16x1xf32> to vector<16x2xf32>
    %44 = arith.divf %40, %43 : vector<16x2xf32>
    %45 = tpu.concatenate %24, %25, %44 in 1 : vector<16x10xf32>, vector<16x10xf32>, vector<16x2xf32> -> vector<16x22xf32>
    %c0_24 = arith.constant 0 : index
    %c0_25 = arith.constant 0 : index
    %46 = vector.load %arg9[%c0_24, %c0_25] : memref<16x22xf32, #tpu.memory_space<vmem>>, vector<16x22xf32>
    tpu.vector_store %arg9[%c0_24, %c0_25], %45 {strides = array<i32>} : memref<16x22xf32, #tpu.memory_space<vmem>>, vector<16x22xf32>,
    return
  }
  func.func @transform_0(%arg0: i32) -> (i32, i32, i32) {
    %c0_i32 = arith.constant 0 : i32
    %c0_i32_0 = arith.constant 0 : i32
    %c0_i32_1 = arith.constant 0 : i32
    return %c0_i32, %arg0, %c0_i32_0 : i32, i32, i32
  }
  func.func @transform_1(%arg0: i32) -> (i32, i32) {
    %c0_i32 = arith.constant 0 : i32
    %c0_i32_0 = arith.constant 0 : i32
    %c0_i32_1 = arith.constant 0 : i32
    return %c0_i32, %c0_i32_0 : i32, i32
  }
  func.func @transform_2(%arg0: i32) -> (i32, i32) {
    %c0_i32 = arith.constant 0 : i32
    %c0_i32_0 = arith.constant 0 : i32
    %c0_i32_1 = arith.constant 0 : i32
    return %c0_i32, %c0_i32_0 : i32, i32
  }
  func.func @transform_3(%arg0: i32) -> (i32, i32) {
    %c0_i32 = arith.constant 0 : i32
    %c0_i32_0 = arith.constant 0 : i32
    %c0_i32_1 = arith.constant 0 : i32
    return %c0_i32, %c0_i32_0 : i32, i32
  }
  func.func @transform_4(%arg0: i32) -> (i32, i32) {
    %c0_i32 = arith.constant 0 : i32
    %c0_i32_0 = arith.constant 0 : i32
    %c0_i32_1 = arith.constant 0 : i32
    return %c0_i32, %c0_i32_0 : i32, i32
  }
  func.func @transform_5(%arg0: i32) -> (i32, i32) {
    %c0_i32 = arith.constant 0 : i32
    %c0_i32_0 = arith.constant 0 : i32
    %c0_i32_1 = arith.constant 0 : i32
    return %c0_i32, %c0_i32_0 : i32, i32
  }
  func.func @transform_6(%arg0: i32) -> (i32, i32) {
    %c0_i32 = arith.constant 0 : i32
    %c0_i32_0 = arith.constant 0 : i32
    %c0_i32_1 = arith.constant 0 : i32
    return %c0_i32, %c0_i32_0 : i32, i32
  }
  func.func @transform_7(%arg0: i32) -> (i32, i32) {
    %c0_i32 = arith.constant 0 : i32
    %c0_i32_0 = arith.constant 0 : i32
    %c0_i32_1 = arith.constant 0 : i32
    return %c0_i32, %c0_i32_0 : i32, i32
  }
  func.func @transform_8(%arg0: i32) -> (i32, i32) {
    %c0_i32 = arith.constant 0 : i32
    %c0_i32_0 = arith.constant 0 : i32
    return %arg0, %c0_i32 : i32, i32
  }
}

</mosaic_0001>

<bundles_post_ra>
// kernel: fnn_ws_aux.1
= control target key start
LH: loop header
LB: loop body
LE: loop exit
PB: predicated region body
PF: predicated region fallthrough
CT: control target
= control target key end

     0   :  { %vm215_vm0 = vcmask 1041408   ;;  %vm208_vm1 = vcmask 556032   ;;  %vm461_vm2 = vcmask 80896   ;;  %vm572_vm3 = vcmask 1044480   ;;  %s944_s19 = smov 10   ;;  %s1283_s1 = inlined_call_operand.vmem [shape: bf16[196,196], index: 1, kind: input, shape index: {}]   ;;  %s1284_s0 = inlined_call_operand.vmem [shape: bf16[2,16,196], index: 0, kind: input, shape index: {}]   ;;  %s1285_s3 = inlined_call_operand.vmem [shape: bf16[196,10], index: 3, kind: input, shape index: {}]   ;;  %s1286_s4 = inlined_call_operand.vmem [shape: f32[1,10], index: 4, kind: input, shape index: {}]   ;;  %s1287_s2 = inlined_call_operand.vmem [shape: f32[1,196], index: 2, kind: input, shape index: {}]   ;;  %s1288_s5 = inlined_call_operand.vmem [shape: bf16[10,2], index: 5, kind: input, shape index: {}]   ;;  %s1289_s6 = inlined_call_operand.vmem [shape: bf16[10,2], index: 6, kind: input, shape index: {}]   ;;  %s1290_s7 = inlined_call_operand.vmem [shape: f32[1,2], index: 7, kind: input, shape index: {}]   ;;  %s1291_s8 = inlined_call_operand.vmem [shape: f32[16,22], index: 8, kind: output, shape index: {}]  }
   0x1   :  { %v772_v0 = vld [vmem:[%s1283_s1 + $0x70] sm:$0xf]  ;;  %v893_v1 = vld [vmem:[%s1283_s1 + $0x74] sm:$0xf0]  ;;  %v892_v2 = vld [vmem:[%s1283_s1 + $0x74] sm:$0xf] }
   0x2   :  { %v773_v3 = vor.u32 %v893_v1, %v772_v0  ;;  %v774_v4 = vld [vmem:[%s1283_s1 + $0x78] sm:$0xf0]  ;;  %v764_v5 = vld [vmem:[%s1283_s1 + $0x60] sm:$0xf]  ;;  %v891_v6 = vld [vmem:[%s1283_s1 + $0x64] sm:$0xf0] }
   0x3   :  { %v777_v7 = vor.u32 %v892_v2, %v774_v4  ;;  %v890_v8 = vld [vmem:[%s1283_s1 + $0x64] sm:$0xf]  ;;  %v766_v9 = vld [vmem:[%s1283_s1 + $0x68] sm:$0xf0]  ;;  %v765_v11 = vor.u32 %v891_v6, %v764_v5  ;;  %v756_v15 = vld [vmem:[%s1283_s1 + $0x50] sm:$0xf] }
   0x4   :  { %v58_v10 = vld [vmem:[%s1283_s1 + $0xc0] sm:$0x33]  ;;  %222 = vmatpush.bf16.msra.mxu0 %v773_v3  ;;  %v769_v14 = vor.u32 %v890_v8, %v766_v9  ;;  %v889_v16 = vld [vmem:[%s1283_s1 + $0x54] sm:$0xf0]  ;;  %v888_v17 = vld [vmem:[%s1283_s1 + $0x54] sm:$0xf] }
   0x5   :  { %v157_v12 = vunpack.c.h.b16 %v58_v10  ;;  %v156_v13 = vunpack.c.l.b16 %v58_v10  ;;  %260 = vmatpush.bf16.msra.mxu2 %v777_v7  ;;  %v758_v19 = vld [vmem:[%s1283_s1 + $0x58] sm:$0xf0]  ;;  %v900_v20 = vld [vmem:[%s1283_s1 + $0xb4] sm:$0xf]  ;;  %v757_v24 = vor.u32 %v889_v16, %v756_v15  ;;  %v748_v25 = vld [vmem:[%s1283_s1 + $0x40] sm:$0xf] }
   0x6   :  { %v806_v21 = vld [vmem:[%s1283_s1 + $0xb8] sm:$0xf0]  ;;  %v887_v26 = vld [vmem:[%s1283_s1 + $0x44] sm:$0xf0]  ;;  %v761_v28 = vor.u32 %v888_v17, %v758_v19  ;;  %v886_v30 = vld [vmem:[%s1283_s1 + $0x44] sm:$0xf] }
   0x7   :  { %v183_v18 = vpack.c.b16 %v157_v12, %v157_v12  ;;  %v182_v22 = vpack.c.b16 %v156_v13, %v156_v13  ;;  %v809_v29 = vor.u32 %v900_v20, %v806_v21  ;;  %v750_v31 = vld [vmem:[%s1283_s1 + $0x48] sm:$0xf0]  ;;  %v804_v32 = vld [vmem:[%s1283_s1 + $0xb0] sm:$0xf]  ;;  %v898_v33 = vld [vmem:[%s1283_s1 + $0xa4] sm:$0xf]  ;;  %v749_v37 = vor.u32 %v887_v26, %v748_v25 }
   0x8   :  { %223 = vmatpush.bf16.msra.mxu0 %v765_v11  ;;  %v798_v34 = vld [vmem:[%s1283_s1 + $0xa8] sm:$0xf0]  ;;  %v901_v35 = vld [vmem:[%s1283_s1 + $0xb4] sm:$0xf0]  ;;  %v796_v38 = vld [vmem:[%s1283_s1 + $0xa0] sm:$0xf]  ;;  %v753_v40 = vor.u32 %v886_v30, %v750_v31 }
   0x9   :  { %v220_v23 = vsel %vm215_vm0, %v183_v18, 0  ;;  %v217_v27 = vsel %vm215_vm0, %v182_v22, 0  ;;  %261 = vmatpush.bf16.msra.mxu2 %v769_v14  ;;  %v805_v36 = vor.u32 %v901_v35, %v804_v32  ;;  %v899_v39 = vld [vmem:[%s1283_s1 + $0xa4] sm:$0xf0]  ;;  %v801_v41 = vor.u32 %v898_v33, %v798_v34  ;;  %v740_v42 = vld [vmem:[%s1283_s1 + $0x30] sm:$0xf] }
   0xa   :  { %282 = vmatpush.bf16.msra.mxu3 %v220_v23  ;;  %244 = vmatpush.bf16.msra.mxu1 %v217_v27  ;;  %v885_v43 = vld [vmem:[%s1283_s1 + $0x34] sm:$0xf0]  ;;  %v884_v44 = vld [vmem:[%s1283_s1 + $0x34] sm:$0xf]  ;;  %v742_v45 = vld [vmem:[%s1283_s1 + $0x38] sm:$0xf0]  ;;  %v797_v48 = vor.u32 %v899_v39, %v796_v38 }
   0xb   :  { %v896_v46 = vld [vmem:[%s1283_s1 + $0x94] sm:$0xf]  ;;  %v790_v47 = vld [vmem:[%s1283_s1 + $0x98] sm:$0xf0]  ;;  %v788_v49 = vld [vmem:[%s1283_s1 + $0x90] sm:$0xf]  ;;  %v741_v50 = vor.u32 %v885_v43, %v740_v42  ;;  %v745_v52 = vor.u32 %v884_v44, %v742_v45 }
   0xc   :  { %224 = vmatpush.bf16.msra.mxu0 %v757_v24  ;;  %v897_v51 = vld [vmem:[%s1283_s1 + $0x94] sm:$0xf0]  ;;  %v793_v53 = vor.u32 %v896_v46, %v790_v47  ;;  %v732_v54 = vld [vmem:[%s1283_s1 + $0x20] sm:$0xf]  ;;  %v883_v55 = vld [vmem:[%s1283_s1 + $0x24] sm:$0xf0] }
   0xd   :  { %262 = vmatpush.bf16.msra.mxu2 %v761_v28  ;;  %v882_v56 = vld [vmem:[%s1283_s1 + $0x24] sm:$0xf]  ;;  %v734_v57 = vld [vmem:[%s1283_s1 + $0x28] sm:$0xf0]  ;;  %v789_v60 = vor.u32 %v897_v51, %v788_v49  ;;  %v780_v61 = vld [vmem:[%s1283_s1 + $0x80] sm:$0xf]  ;;  %v733_v63 = vor.u32 %v883_v55, %v732_v54 }
   0xe   :  { %283 = vmatpush.bf16.msra.mxu3 %v809_v29  ;;  %245 = vmatpush.bf16.msra.mxu1 %v805_v36  ;;  %v894_v58 = vld [vmem:[%s1283_s1 + $0x84] sm:$0xf]  ;;  %v782_v59 = vld [vmem:[%s1283_s1 + $0x88] sm:$0xf0]  ;;  %v895_v62 = vld [vmem:[%s1283_s1 + $0x84] sm:$0xf0]  ;;  %v737_v2 = vor.u32 %v882_v56, %v734_v57 }
   0xf   :  { %v724_v0 = vld [vmem:[%s1283_s1 + $0x10] sm:$0xf]  ;;  %v881_v1 = vld [vmem:[%s1283_s1 + $0x14] sm:$0xf0]  ;;  %v785_v3 = vor.u32 %v894_v58, %v782_v59  ;;  %v874_v4 = vld [vmem:[%s1284_s0 + $0x4] sm:$0xf]  ;;  %v781_v9 = vor.u32 %v895_v62, %v780_v61 }
  0x10   :  { %225 = vmatpush.bf16.msra.mxu0 %v749_v37  ;;  %v702_v5 = vld [vmem:[%s1284_s0 + $0x8] sm:$0xf0]  ;;  %v334_v6 = vld [vmem:[%s1285_s3 + $0x60] sm:$0x3]  ;;  %v880_v7 = vld [vmem:[%s1283_s1 + $0x14] sm:$0xf]  ;;  %v725_v12 = vor.u32 %v881_v1, %v724_v0 }
  0x11   :  { %263 = vmatpush.bf16.msra.mxu2 %v753_v40  ;;  %v726_v8 = vld [vmem:[%s1283_s1 + $0x18] sm:$0xf0]  ;;  %v388_v10 = vunpack.c.l.b16 %v334_v6  ;;  %v705_v13 = vor.u32 %v874_v4, %v702_v5  ;;  %v716_v16 = vld [vmem:[%s1283_s1] sm:$0xf]  ;;  %v879_v17 = vld [vmem:[%s1283_s1 + $0x4] sm:$0xf0] }
  0x12   :  { %284 = vmatpush.bf16.msra.mxu3 %v801_v41  ;;  %246 = vmatpush.bf16.msra.mxu1 %v797_v48  ;;  %v909_v11 = vld [vmem:[%s1285_s3 + $0x38] sm:$0xff]  ;;  %v729_v15 = vor.u32 %v880_v7, %v726_v8  ;;  %v878_v18 = vld [vmem:[%s1283_s1 + $0x4] sm:$0xf]  ;;  %v718_v19 = vld [vmem:[%s1283_s1 + $0x8] sm:$0xf0]  ;;  %v717_v23 = vor.u32 %v879_v17, %v716_v16 }
  0x13   :  { %v401_v14 = vpack.c.b16 %v388_v10, %v388_v10  ;;  %v908_v21 = vld [vmem:[%s1285_s3 + $0x30] sm:$0xff]  ;;  %v913_v22 = vld [vmem:[%s1285_s3 + $0x58] sm:$0xff]  ;;  %v700_v24 = vld [vmem:[%s1284_s0] sm:$0xf]  ;;  %v721_v26 = vor.u32 %v878_v18, %v718_v19 }
  0x14   :  { %226 = vmatpush.bf16.msra.mxu0 %v741_v50  ;;  %v875_v25 = vld [vmem:[%s1284_s0 + $0x4] sm:$0xf0]  ;;  %v906_v29 = vld [vmem:[%s1285_s3 + $0x20] sm:$0xff]  ;;  %v876_v30 = vld [vmem:[%s1284_s0 + $0x14] sm:$0xf] }
  0x15   :  { %264 = vmatpush.bf16.msra.mxu2 %v745_v52  ;;  %v421_v20 = vsel %vm215_vm0, %v401_v14, 0  ;;  %v701_v27 = vor.u32 %v875_v25, %v700_v24  ;;  %v907_v28 = vld [vmem:[%s1285_s3 + $0x28] sm:$0xff]  ;;  %v710_v31 = vld [vmem:[%s1284_s0 + $0x18] sm:$0xf0]  ;;  %v708_v33 = vld [vmem:[%s1284_s0 + $0x10] sm:$0xf] }
  0x16   :  { %285 = vmatpush.bf16.msra.mxu3 %v793_v53  ;;  %247 = vmatpush.bf16.msra.mxu1 %v789_v60  ;;  %v713_v32 = vor.u32 %v876_v30, %v710_v31  ;;  %v877_v34 = vld [vmem:[%s1284_s0 + $0x14] sm:$0xf0]  ;;  %v912_v37 = vld [vmem:[%s1285_s3 + $0x50] sm:$0xff]  ;;  %v903_v39 = vld [vmem:[%s1285_s3 + $0x8] sm:$0xff] }
  0x17   :  { %v709_v35 = vor.u32 %v877_v34, %v708_v33  ;;  %v905_v36 = vld [vmem:[%s1285_s3 + $0x18] sm:$0xff]  ;;  %v904_v38 = vld [vmem:[%s1285_s3 + $0x10] sm:$0xff]  ;;  %v902_v40 = vld [vmem:[%s1285_s3] sm:$0xff] }
  0x18   :  { %227 = vmatpush.bf16.msra.mxu0 %v733_v63  ;;  %v911_v41 = vld [vmem:[%s1285_s3 + $0x48] sm:$0xff]  ;;  %v910_v42 = vld [vmem:[%s1285_s3 + $0x40] sm:$0xff] }
  0x19   :  { %265 = vmatpush.bf16.msra.mxu2 %v737_v2  ;;  %v59_v44 = vld [vmem:[%s1287_s2] sm:$0x3] }
  0x1a   :  { %286 = vmatpush.bf16.msra.mxu3 %v785_v3  ;;  %248 = vmatpush.bf16.msra.mxu1 %v781_v9  ;;  %v61_v45 = vperm.slane %v59_v44, 0  ;;  %v62_v52 = vperm.slane %v59_v44, 1 }
  0x1c   :  { %228 = vmatpush.bf16.msra.mxu0 %v725_v12 }
  0x1d   :  { %812 = vmatmul.msk.bf16.vlgmr.msra.gmra.mxu3 %vm208_vm1, %v705_v13  ;;  %266 = vmatpush.bf16.msra.mxu2 %v729_v15 }
  0x1e   :  { %423 = vmatpush.bf16.msrb.mxu1 %v909_v11  ;;  %445 = vmatpush.bf16.msrb.mxu3 %v421_v20 }
  0x1f   :  { %810 = vmatmul.msk.bf16.vlgmr.msra.gmra.mxu1 %vm208_vm1, %v705_v13 }
  0x20   :  { %229 = vmatpush.bf16.msra.mxu0 %v717_v23 }
  0x21   :  { %267 = vmatpush.bf16.msra.mxu2 %v721_v26 }
  0x22   :  { %424 = vmatpush.bf16.msrb.mxu1 %v908_v21  ;;  %446 = vmatpush.bf16.msrb.mxu3 %v913_v22 }
  0x23   :  { %230 = vmatmul.bf16.vlgmr.msra.gmra.mxu0 %v701_v27 }
  0x24   :  { %268 = vmatmul.bf16.vlgmr.msra.gmra.mxu2 %v701_v27  ;;  %v918_v27 = vld [vmem:[%s1286_s4] ss:$0 sm:$0xff] }
  0x26   :  { %425 = vmatpush.bf16.msrb.mxu1 %v907_v28  ;;  %447 = vmatpush.bf16.msrb.mxu3 %v912_v37 }
  0x2a   :  { %426 = vmatpush.bf16.msrb.mxu1 %v906_v29  ;;  %448 = vmatpush.bf16.msrb.mxu3 %v911_v41 }
  0x2d   :  { %813 = vmatmul.msk.bf16.gmra.mxu3 %vm208_vm1, %v713_v32 }
  0x2e   :  { %427 = vmatpush.bf16.msrb.mxu1 %v905_v36  ;;  %449 = vmatpush.bf16.msrb.mxu3 %v910_v42 }
  0x2f   :  { %811 = vmatmul.msk.bf16.gmra.mxu1 %vm208_vm1, %v713_v32 }
  0x32   :  { %428 = vmatpush.bf16.msrb.mxu1 %v904_v38 }
  0x33   :  { %235 = vmatmul.bf16.gmra.mxu0 %v709_v35 }
  0x34   :  { %273 = vmatmul.bf16.gmra.mxu2 %v709_v35 }
  0x36   :  { %429 = vmatpush.bf16.msrb.mxu1 %v903_v39 }
  0x3a   :  { %430 = vmatpush.bf16.msrb.mxu1 %v902_v40 }
  0x9c   :  { %v250_v43 = vpop.f32.mrf.mxu1 }
  0xa0   :  { %v231_v46 = vpop.f32.mrf.mxu0  ;;  %v288_v48 = vpop.f32.mrf.mxu3 }
  0xa1   :  { %v232_v47 = vadd.f32 %v231_v46, %v61_v45 }
  0xa3   :  { %v251_v50 = vadd.f32 %v250_v43, %v232_v47 }
  0xa4   :  { %v252_v49 = vpop.f32.mrf.mxu1 }
  0xa5   :  { %v298_v55 = vmax.f32 %v251_v50, 0.0 }
  0xa7   :  { %v269_v51 = vpop.f32.mrf.mxu2 }
  0xa8   :  { %v233_v53 = vpop.f32.mrf.mxu0  ;;  %v270_v57 = vadd.f32 %v269_v51, %v62_v52  ;;  %v290_v58 = vpop.f32.mrf.mxu3 }
  0xa9   :  { %v234_v54 = vadd.f32 %v233_v53, %v61_v45 }
  0xaa   :  { %v289_v63 = vadd.f32 %v288_v48, %v270_v57 }
  0xab   :  { %v253_v56 = vadd.f32 %v252_v49, %v234_v54 }
  0xac   :  { %v255_v60 = vpop.f32.mrf.mxu1  ;;  %v299_v4 = vmax.f32 %v289_v63, 0.0 }
  0xad   :  { %v300_v59 = vmax.f32 %v253_v56, 0.0 }
  0xaf   :  { %v306_v61 = vpack.c.bf16 %v300_v59, %v298_v55  ;;  %v271_v62 = vpop.f32.mrf.mxu2 }
  0xb0   :  { %v272_v0 = vadd.f32 %v271_v62, %v62_v52  ;;  %v236_v1 = vpop.f32.mrf.mxu0  ;;  %v293_v7 = vpop.f32.mrf.mxu3 }
  0xb1   :  { %431 = vmatmul.bf16.vlgmr.msrb.gmra.mxu1 %v306_v61  ;;  %v237_v3 = vadd.f32 %v236_v1, %v61_v45 }
  0xb2   :  { %v291_v2 = vadd.f32 %v290_v58, %v272_v0 }
  0xb3   :  { %v256_v8 = vadd.f32 %v255_v60, %v237_v3  ;;  %v871_v3 = vld [vmem:[%s1288_s5] sm:$0xf] }
  0xb4   :  { %v301_v5 = vmax.f32 %v291_v2, 0.0  ;;  %v257_v11 = vpop.f32.mrf.mxu1 }
  0xb5   :  { %v302_v13 = vmax.f32 %v256_v8, 0.0  ;;  %v915_v8 = vld [vmem:[%s1289_s6] sm:$0x10] }
  0xb6   :  { %v307_v6 = vpack.c.bf16 %v301_v5, %v299_v4  ;;  %v914_v4 = vld [vmem:[%s1288_s5] sm:$0x10] }
  0xb7   :  { %v274_v9 = vpop.f32.mrf.mxu2  ;;  %v872_v5 = vor.u32 %v914_v4, %v871_v3 }
  0xb8   :  { %862 = vmatmul.msk.bf16.vlgmr.msrb.gmra.mxu3 %vm208_vm1, %v307_v6  ;;  %v238_v10 = vpop.f32.mrf.mxu0  ;;  %v275_v15 = vadd.f32 %v274_v9, %v62_v52  ;;  %v295_v21 = vpop.f32.mrf.mxu3 }
  0xb9   :  { %v239_v12 = vadd.f32 %v238_v10, %v61_v45  ;;  %v599_v6 = vsel %vm572_vm3, %v872_v5, 0 }
  0xba   :  { %v294_v19 = vadd.f32 %v293_v7, %v275_v15  ;;  %608 = vmatpush.bf16.msrb.mxu2 %v599_v6  ;;  %v866_v7 = vld [vmem:[%s1289_s6] sm:$0xf] }
  0xbb   :  { %v258_v14 = vadd.f32 %v257_v11, %v239_v12  ;;  %v867_v9 = vor.u32 %v915_v8, %v866_v7 }
  0xbc   :  { %v303_v23 = vmax.f32 %v294_v19, 0.0 }
  0xbd   :  { %v304_v16 = vmax.f32 %v258_v14, 0.0  ;;  %v574_v10 = vsel %vm572_vm3, %v867_v9, 0 }
  0xbe   :  { %583 = vmatpush.bf16.msrb.mxu0 %v574_v10 }
  0xbf   :  { %v276_v17 = vpop.f32.mrf.mxu2  ;;  %v308_v18 = vpack.c.bf16 %v304_v16, %v302_v13 }
  0xc0   :  { %v277_v20 = vadd.f32 %v276_v17, %v62_v52 }
  0xc1   :  { %436 = vmatmul.bf16.gmra.mxu1 %v308_v18 }
  0xc2   :  { %v296_v22 = vadd.f32 %v295_v21, %v277_v20 }
  0xc4   :  { %v305_v24 = vmax.f32 %v296_v22, 0.0 }
  0xc6   :  { %v309_v25 = vpack.c.bf16 %v305_v24, %v303_v23 }
  0xc8   :  { %863 = vmatmul.msk.bf16.gmra.mxu3 %vm208_vm1, %v309_v25 }
 0x12e   :  { %v432_v26 = vpop.f32.mrf.mxu1 }
 0x12f   :  { %v433_v28 = vadd.f32 %v918_v27, %v432_v26 }
 0x136   :  { %v434_v29 = vpop.f32.mrf.mxu1 }
 0x137   :  { %v435_v33 = vadd.f32 %v918_v27, %v434_v29 }
 0x13b   :  { %v451_v30 = vpop.f32.mrf.mxu3 }
 0x13c   :  { %v452_v31 = vadd.f32 %v451_v30, %v433_v28 }
 0x13e   :  { %v462_v32 = vsel %vm461_vm2, %v452_v31, -inf  ;;  %v437_v36 = vpop.f32.mrf.mxu1 }
 0x13f   :  { %463 = vmax.xlane.f32.xlu0 %v462_v32  ;;  %v438_v38 = vadd.f32 %v918_v27, %v437_v36 }
 0x143   :  { %v453_v34 = vpop.f32.mrf.mxu3 }
 0x144   :  { %v454_v35 = vadd.f32 %v453_v34, %v435_v33 }
 0x146   :  { %v465_v37 = vsel %vm461_vm2, %v454_v35, -inf  ;;  %v439_v42 = vpop.f32.mrf.mxu1 }
 0x147   :  { %466 = vmax.xlane.f32.xlu0 %v465_v37  ;;  %v440_v43 = vadd.f32 %v918_v27, %v439_v42 }
 0x14b   :  { %v456_v39 = vpop.f32.mrf.mxu3 }
 0x14c   :  { %v457_v40 = vadd.f32 %v456_v39, %v438_v38 }
 0x14e   :  { %v468_v41 = vsel %vm461_vm2, %v457_v40, -inf }
 0x14f   :  { %469 = vmax.xlane.f32.xlu1 %v468_v41 }
 0x153   :  { %v458_v44 = vpop.f32.mrf.mxu3 }
 0x154   :  { %v459_v45 = vadd.f32 %v458_v44, %v440_v43 }
 0x156   :  { %v471_v46 = vsel %vm461_vm2, %v459_v45, -inf }
 0x157   :  { %472 = vmax.xlane.f32.xlu1 %v471_v46 }
 0x1b2   :  { %v464_v47 = vpop.xlane.xlu0 %463 }
 0x1b3   :  { %v474_v48 = vsub.f32 %v452_v31, %v464_v47 }
 0x1b5   :  { %v478_v49 = vmul.f32 1.442695, %v474_v48 }
 0x1b7   :  { %920 = vpow2.f32 %v478_v49 }
 0x1ba   :  { %v467_v50 = vpop.xlane.xlu0 %466 }
 0x1bb   :  { %v475_v51 = vsub.f32 %v454_v35, %v467_v50 }
 0x1bd   :  { %v1220_v52 = vpop.eup %920  ;;  %v480_v53 = vmul.f32 1.442695, %v475_v51 }
 0x1be   :  { %v486_v54 = vsel %vm461_vm2, %v1220_v52, 0.0 }
 0x1bf   :  { %922 = vpow2.f32 %v480_v53  ;;  %487 = vadd.xlane.f32.xlu2 %v486_v54 }
 0x1c2   :  { %v470_v55 = vpop.xlane.xlu1 %469 }
 0x1c3   :  { %v476_v56 = vsub.f32 %v457_v40, %v470_v55 }
 0x1c5   :  { %v1224_v57 = vpop.eup %922  ;;  %v482_v58 = vmul.f32 1.442695, %v476_v56 }
 0x1c6   :  { %v489_v59 = vsel %vm461_vm2, %v1224_v57, 0.0 }
 0x1c7   :  { %924 = vpow2.f32 %v482_v58  ;;  %490 = vadd.xlane.f32.xlu2 %v489_v59 }
 0x1ca   :  { %v473_v60 = vpop.xlane.xlu1 %472 }
 0x1cb   :  { %v477_v61 = vsub.f32 %v459_v45, %v473_v60 }
 0x1cd   :  { %v1228_v62 = vpop.eup %924  ;;  %v484_v63 = vmul.f32 1.442695, %v477_v61 }
 0x1ce   :  { %v492_v0 = vsel %vm461_vm2, %v1228_v62, 0.0 }
 0x1cf   :  { %926 = vpow2.f32 %v484_v63  ;;  %493 = vadd.xlane.f32.xlu0 %v492_v0  ;;  %v919_v0 = vld [vmem:[%s1290_s7] ss:$0 sm:$0xff]  ;;  %s945_s7 = smov 20  }
 0x1d5   :  { %v1232_v1 = vpop.eup %926 }
 0x1d6   :  { %v495_v2 = vsel %vm461_vm2, %v1232_v1, 0.0 }
 0x1d7   :  { %496 = vadd.xlane.f32.xlu1 %v495_v2 }
 0x232   :  { %v488_v11 = vpop.xlane.xlu2 %487 }
 0x233   :  { %928 = vrcp.f32 %v488_v11  ;;  %v509_v21 = vand.u32 2147483648, %v488_v11  ;;  %vm503_vm5 = vweird.f32 %v488_v11  ;;  %v507_v23 = vand.u32 2147483647, %v488_v11 }
 0x235   :  { %v510_v29 = vor.u32 1.1754944e-38, %v509_v21  ;;  %vm508_vm9 = vcmp.eq.f32.partialorder %v507_v23, 8.507059e+37 }
 0x239   :  { %v929_v12 = vpop.eup %928 }
 0x23a   :  { %v499_v13 = vmul.f32 %v929_v12, %v488_v11  ;;  %v491_v14 = vpop.xlane.xlu2 %490  ;;  %vm504_vm4 = vweird.f32 %v929_v12 }
 0x23b   :  { %930 = vrcp.f32 %v491_v14  ;;  %vm1248_vm6 = vmor %vm503_vm5, %vm504_vm4  ;;  %v524_v26 = vand.u32 2147483648, %v491_v14  ;;  %v522_v28 = vand.u32 2147483647, %v491_v14  ;;  %vm518_vm8 = vweird.f32 %v491_v14 }
 0x23c   :  { %v500_v15 = vsub.f32 1.0, %v499_v13  ;;  %vm621_vm5 = vcmask 15360  }
 0x23d   :  { %v525_v33 = vor.u32 1.1754944e-38, %v524_v26  ;;  %vm523_vm11 = vcmp.eq.f32.partialorder %v522_v28, 8.507059e+37 }
 0x23e   :  { %v501_v16 = vmul.f32 %v929_v12, %v500_v15 }
 0x240   :  { %v502_v20 = vadd.f32 %v929_v12, %v501_v16 }
 0x241   :  { %v931_v17 = vpop.eup %930 }
 0x242   :  { %v514_v18 = vmul.f32 %v931_v17, %v491_v14  ;;  %v494_v19 = vpop.xlane.xlu0 %493  ;;  %vm519_vm7 = vweird.f32 %v931_v17  ;;  %v506_v27 = vsel %vm1248_vm6, %v929_v12, %v502_v20 }
 0x243   :  { %932 = vrcp.f32 %v494_v19  ;;  %vm520_vm10 = vmor %vm518_vm8, %vm519_vm7  ;;  %v511_v36 = vsel %vm508_vm9, %v510_v29, %v506_v27  ;;  %v539_v46 = vand.u32 2147483648, %v494_v19  ;;  %vm533_vm13 = vweird.f32 %v494_v19 }
 0x244   :  { %v515_v22 = vsub.f32 1.0, %v514_v18  ;;  %v1255_v39 = vmul.f32 %v1220_v52, %v511_v36  ;;  %v537_v47 = vand.u32 2147483647, %v494_v19 }
 0x245   :  { %v540_v53 = vor.u32 1.1754944e-38, %v539_v46 }
 0x246   :  { %v516_v25 = vmul.f32 %v931_v17, %v515_v22  ;;  %vm538_vm0 = vcmp.eq.f32.partialorder %v537_v47, 8.507059e+37 }
 0x248   :  { %v517_v30 = vadd.f32 %v931_v17, %v516_v25 }
 0x249   :  { %v933_v31 = vpop.eup %932 }
 0x24a   :  { %v521_v32 = vsel %vm520_vm10, %v931_v17, %v517_v30  ;;  %v529_v34 = vmul.f32 %v933_v31, %v494_v19  ;;  %v497_v35 = vpop.xlane.xlu1 %496  ;;  %vm534_vm12 = vweird.f32 %v933_v31 }
 0x24b   :  { %934 = vrcp.f32 %v497_v35  ;;  %v526_v38 = vsel %vm523_vm11, %v525_v33, %v521_v32  ;;  %vm535_vm14 = vmor %vm533_vm13, %vm534_vm12  ;;  %v554_v49 = vand.u32 2147483648, %v497_v35  ;;  %v552_v52 = vand.u32 2147483647, %v497_v35 }
 0x24c   :  { %v530_v37 = vsub.f32 1.0, %v529_v34  ;;  %v1258_v40 = vmul.f32 %v1224_v57, %v526_v38  ;;  %vm548_vm1 = vweird.f32 %v497_v35 }
 0x24d   :  { %v555_v55 = vor.u32 1.1754944e-38, %v554_v49  ;;  %vm553_vm4 = vcmp.eq.f32.partialorder %v552_v52, 8.507059e+37 }
 0x24e   :  { %v531_v41 = vmul.f32 %v933_v31, %v530_v37  ;;  %v558_v42 = vpack.c.bf16 %v1258_v40, %v1255_v39 }
 0x250   :  { %873 = vmatmul.msk.bf16.vlgmr.msrb.gmra.mxu2 %vm461_vm2, %v558_v42  ;;  %v532_v44 = vadd.f32 %v933_v31, %v531_v41 }
 0x251   :  { %v935_v43 = vpop.eup %934 }
 0x252   :  { %v544_v45 = vmul.f32 %v935_v43, %v497_v35  ;;  %v536_v50 = vsel %vm535_vm14, %v933_v31, %v532_v44  ;;  %vm549_vm15 = vweird.f32 %v935_v43  ;;  %vm688_vm14 = vcmask 162816  }
 0x253   :  { %vm550_vm3 = vmor %vm548_vm1, %vm549_vm15  ;;  %v541_v56 = vsel %vm538_vm0, %v540_v53, %v536_v50  ;;  %vm691_vm15 = vcmask 179200  }
 0x254   :  { %v545_v48 = vsub.f32 1.0, %v544_v45  ;;  %v542_v59 = vmul.f32 %v1228_v62, %v541_v56 }
 0x256   :  { %v546_v51 = vmul.f32 %v935_v43, %v545_v48 }
 0x258   :  { %v547_v54 = vadd.f32 %v935_v43, %v546_v51 }
 0x25a   :  { %v551_v57 = vsel %vm550_vm3, %v935_v43, %v547_v54 }
 0x25b   :  { %v556_v58 = vsel %vm553_vm4, %v555_v55, %v551_v57 }
 0x25c   :  { %v557_v60 = vmul.f32 %v1232_v1, %v556_v58 }
 0x25e   :  { %v561_v61 = vpack.c.bf16 %v557_v60, %v542_v59 }
 0x260   :  { %868 = vmatmul.msk.bf16.vlgmr.msrb.gmra.mxu0 %vm461_vm2, %v561_v61 }
 0x2d3   :  { %v610_v63 = vpop.f32.mrf.mxu2 }
 0x2db   :  { %v612_v6 = vpop.f32.mrf.mxu2 }
 0x2dd   :  { %v585_v2 = vpop.f32.mrf.mxu0 }
 0x2de   :  { %v611_v3 = vadd.f32 %v610_v63, %v585_v2 }
 0x2e0   :  { %v619_v4 = vadd.f32 %v919_v0, %v611_v3 }
 0x2e2   :  { %v622_v5 = vsel %vm621_vm5, %v619_v4, -inf }
 0x2e3   :  { %623 = vmax.xlane.f32.xlu2 %v622_v5 }
 0x2e5   :  { %v587_v7 = vpop.f32.mrf.mxu0 }
 0x2e6   :  { %v613_v62 = vadd.f32 %v612_v6, %v587_v7 }
 0x2e8   :  { %v620_v8 = vadd.f32 %v919_v0, %v613_v62 }
 0x2ea   :  { %v625_v1 = vsel %vm621_vm5, %v620_v8, -inf }
 0x2eb   :  { %626 = vmax.xlane.f32.xlu0 %v625_v1 }
 0x2ff   :  { %672 = vrot.lane.b32.xlu0 %v542_v59, %s944_s19 }
 0x356   :  { %v624_v9 = vpop.xlane.xlu2 %623 }
 0x357   :  { %v628_v10 = vsub.f32 %v619_v4, %v624_v9 }
 0x359   :  { %v630_v11 = vmul.f32 1.442695, %v628_v10 }
 0x35b   :  { %936 = vpow2.f32 %v630_v11 }
 0x35e   :  { %v627_v12 = vpop.xlane.xlu0 %626 }
 0x35f   :  { %v629_v13 = vsub.f32 %v620_v8, %v627_v12 }
 0x361   :  { %v937_v14 = vpop.eup %936  ;;  %v632_v15 = vmul.f32 1.442695, %v629_v13 }
 0x362   :  { %v634_v16 = vsel %vm621_vm5, %v937_v14, 0.0 }
 0x363   :  { %938 = vpow2.f32 %v632_v15  ;;  %635 = vadd.xlane.f32.xlu1 %v634_v16 }
 0x369   :  { %v939_v17 = vpop.eup %938 }
 0x36a   :  { %v637_v18 = vsel %vm621_vm5, %v939_v17, 0.0 }
 0x36b   :  { %638 = vadd.xlane.f32.xlu2 %v637_v18 }
 0x371   :  { %v673_v45 = vpop.permute.xlu0 %672 }
 0x372   :  { %v686_v46 = vsel %vm461_vm2, %v1255_v39, %v673_v45 }
 0x37c   :  { %674 = vrot.lane.b32.xlu1 %v557_v60, %s944_s19 }
 0x3d6   :  { %v636_v19 = vpop.xlane.xlu1 %635 }
 0x3d7   :  { %940 = vrcp.f32 %v636_v19  ;;  %v651_v24 = vand.u32 2147483648, %v636_v19  ;;  %v649_v26 = vand.u32 2147483647, %v636_v19  ;;  %vm645_vm7 = vweird.f32 %v636_v19 }
 0x3d9   :  { %v652_v29 = vor.u32 1.1754944e-38, %v651_v24  ;;  %vm650_vm9 = vcmp.eq.f32.partialorder %v649_v26, 8.507059e+37 }
 0x3dd   :  { %v941_v20 = vpop.eup %940 }
 0x3de   :  { %v641_v21 = vmul.f32 %v941_v20, %v636_v19  ;;  %v639_v22 = vpop.xlane.xlu2 %638  ;;  %vm646_vm6 = vweird.f32 %v941_v20 }
 0x3df   :  { %942 = vrcp.f32 %v639_v22  ;;  %vm647_vm8 = vmor %vm645_vm7, %vm646_vm6  ;;  %v666_v35 = vand.u32 2147483648, %v639_v22  ;;  %v664_v37 = vand.u32 2147483647, %v639_v22  ;;  %vm660_vm11 = vweird.f32 %v639_v22 }
 0x3e0   :  { %v642_v23 = vsub.f32 1.0, %v641_v21 }
 0x3e1   :  { %v667_v41 = vor.u32 1.1754944e-38, %v666_v35  ;;  %vm665_vm13 = vcmp.eq.f32.partialorder %v664_v37, 8.507059e+37 }
 0x3e2   :  { %v643_v25 = vmul.f32 %v941_v20, %v642_v23 }
 0x3e4   :  { %v644_v27 = vadd.f32 %v941_v20, %v643_v25 }
 0x3e5   :  { %v943_v28 = vpop.eup %942 }
 0x3e6   :  { %v656_v30 = vmul.f32 %v943_v28, %v639_v22  ;;  %v648_v31 = vsel %vm647_vm8, %v941_v20, %v644_v27  ;;  %vm661_vm10 = vweird.f32 %v943_v28 }
 0x3e7   :  { %v653_v32 = vsel %vm650_vm9, %v652_v29, %v648_v31  ;;  %vm662_vm12 = vmor %vm660_vm11, %vm661_vm10 }
 0x3e8   :  { %v657_v33 = vsub.f32 1.0, %v656_v30  ;;  %v654_v34 = vmul.f32 %v937_v14, %v653_v32 }
 0x3ea   :  { %v658_v36 = vmul.f32 %v943_v28, %v657_v33  ;;  %680 = vrot.lane.b32.xlu2 %v654_v34, %s945_s7 }
 0x3ec   :  { %v659_v38 = vadd.f32 %v943_v28, %v658_v36 }
 0x3ee   :  { %v663_v42 = vsel %vm662_vm12, %v943_v28, %v659_v38  ;;  %v675_v49 = vpop.permute.xlu1 %674 }
 0x3ef   :  { %v668_v43 = vsel %vm665_vm13, %v667_v41, %v663_v42  ;;  %v687_v50 = vsel %vm461_vm2, %v1258_v40, %v675_v49 }
 0x3f0   :  { %v669_v44 = vmul.f32 %v939_v17, %v668_v43 }
 0x3f2   :  { %682 = vrot.lane.b32.xlu0 %v669_v44, %s945_s7 }
 0x444   :  { %v681_v47 = vpop.permute.xlu2 %680 }
 0x445   :  { %v689_v48 = vsel %vm688_vm14, %v686_v46, %v681_v47 }
 0x446   :  { %692 = vst.msk [vmem:[%s1291_s8] sm:$0xff] %vm691_vm15, %v689_v48 }
 0x464   :  { %v683_v51 = vpop.permute.xlu0 %682 }
 0x465   :  { %v690_v52 = vsel %vm688_vm14, %v687_v50, %v683_v51 }
 0x466   :  { %693 = vst.msk [vmem:[%s1291_s8 + $0x8] sm:$0xff] %vm691_vm15, %v690_v52 }

</bundles_post_ra>
